<compile_context>
chip_gen: v7x
topology: tpu7x:2x2x1
jax: 0.10.0
libtpu: 0.0.40
codegen_flags: <defaults>
</compile_context>

<pallas_src>
import jax
import jax.numpy as jnp
from jax.experimental import pallas as pl
from jax.experimental.pallas import tpu as pltpu

K_IN = 28 * 28      # 784
K_PAD = 896         # 7 * 128, lane-aligned contraction dim for the first matmul
HIDDEN = 256
N_CLASSES = 10
N_OUT_PAD = 128     # lane-dense final output width
MAX_TILE_B = 1024   # batch rows per grid step for large batches


def _round_up(n, m):
    return ((n + m - 1) // m) * m


def _mlp_kernel(x_ref, w1_ref, b1_ref, w2_ref, b2_ref, w3_ref, b3_ref, o_ref):
    # x_ref: (TILE_B, K_PAD); w*: (in, out); b*: (1, out); o_ref: (TILE_B, N_OUT_PAD)
    x = x_ref[...]

    # Linear(784 -> 256) + ReLU   (Dropout(0.2) is identity at inference)
    h1 = jnp.dot(x, w1_ref[...], preferred_element_type=jnp.float32) + b1_ref[...]
    h1 = jnp.maximum(h1, 0.0)

    # Linear(256 -> 256) + ReLU   (Dropout(0.2) is identity at inference)
    h2 = jnp.dot(h1, w2_ref[...], preferred_element_type=jnp.float32) + b2_ref[...]
    h2 = jnp.maximum(h2, 0.0)

    # Linear(256 -> 10), padded to a lane-dense 128-wide output tile.
    o_ref[...] = jnp.dot(h2, w3_ref[...], preferred_element_type=jnp.float32) + b3_ref[...]


def mnist_forward(x_nchw, params):
    """x_nchw: (B, 1, 28, 28) float32. params: dict of (in,out) weights / (1,out) biases."""
    B = x_nchw.shape[0]
    # features = nn.Sequential() -> identity; then x.view(B, -1)
    x = x_nchw.reshape(B, -1).astype(jnp.float32)              # (B, 784)

    # Batch tile: biggest multiple of 8 up to MAX_TILE_B; tiny batches stay single-tile.
    tile_b = min(MAX_TILE_B, _round_up(B, 8))
    b_pad = _round_up(B, tile_b)

    # Zero-pad: batch to a multiple of tile_b, contraction dim 784 -> 896.
    x = jnp.pad(x, ((0, b_pad - B), (0, K_PAD - K_IN)))        # (b_pad, 896)

    w1 = jnp.pad(params["w1"], ((0, K_PAD - K_IN), (0, 0)))    # (896, 256)
    b1 = params["b1"]                                          # (1, 256)
    w2 = params["w2"]                                          # (256, 256)
    b2 = params["b2"]                                          # (1, 256)
    # Lane-dense final layer: pad N=10 -> 128 with zeros.
    w3 = jnp.pad(params["w3"], ((0, 0), (0, N_OUT_PAD - N_CLASSES)))  # (256, 128)
    b3 = jnp.pad(params["b3"], ((0, 0), (0, N_OUT_PAD - N_CLASSES)))  # (1, 128)

    grid = (b_pad // tile_b,)

    # Weights/biases: full-array blocks, constant index_map -> VMEM-resident across steps.
    def resident(arr):
        return pl.BlockSpec(arr.shape, lambda i: (0,) * arr.ndim)

    out = pl.pallas_call(
        _mlp_kernel,
        out_shape=jax.ShapeDtypeStruct((b_pad, N_OUT_PAD), jnp.float32),
        grid=grid,
        in_specs=[
            pl.BlockSpec((tile_b, K_PAD), lambda i: (i, 0)),   # streamed x tiles
            resident(w1), resident(b1),
            resident(w2), resident(b2),
            resident(w3), resident(b3),
        ],
        out_specs=pl.BlockSpec((tile_b, N_OUT_PAD), lambda i: (i, 0)),
        compiler_params=pltpu.CompilerParams(
            dimension_semantics=("parallel",),   # v7x: split batch tiles across 2 TCs
            vmem_limit_bytes=48 << 20,           # headroom under v7x's 64 MiB physical
        ),
    )(x, w1, b1, w2, b2, w3, b3)

    return out[:B, :N_CLASSES]


def init_params(key):
    """Deterministic init mirroring nn.Linear.

    PyTorch Linear stores weight as (out, in) and computes y = x @ W.T + b.
    We initialize in PyTorch layout and transpose to (in, out) for the kernel.
    """
    ks = jax.random.split(key, 6)

    def linear(kw, kb, fan_in, fan_out):
        bound = 1.0 / (fan_in ** 0.5)
        w_torch = jax.random.uniform(kw, (fan_out, fan_in), jnp.float32, -bound, bound)
        b = jax.random.uniform(kb, (fan_out,), jnp.float32, -bound, bound)
        return w_torch.T, b.reshape(1, fan_out)

    w1, b1 = linear(ks[0], ks[1], K_IN, HIDDEN)
    w2, b2 = linear(ks[2], ks[3], HIDDEN, HIDDEN)
    w3, b3 = linear(ks[4], ks[5], HIDDEN, N_CLASSES)
    return {"w1": w1, "b1": b1, "w2": w2, "b2": b2, "w3": w3, "b3": b3}


def reference_forward(x_nchw, params):
    """Pure-JAX reference for sanity checking (eval-mode: dropout = identity)."""
    x = x_nchw.reshape(x_nchw.shape[0], -1).astype(jnp.float32)
    h1 = jnp.maximum(x @ params["w1"] + params["b1"], 0.0)
    h2 = jnp.maximum(h1 @ params["w2"] + params["b2"], 0.0)
    return h2 @ params["w3"] + params["b3"]


if __name__ == "__main__":
    key = jax.random.PRNGKey(0)
    k_param, k_x = jax.random.split(key)

    params = init_params(k_param)
    # MNIST-shaped input: (batch=2, channels=1, 28, 28), NCHW like PyTorch.
    x = jax.random.normal(k_x, (2, 1, 28, 28), dtype=jnp.float32)

    out = mnist_forward(x, params)
    out = jax.block_until_ready(out)

    ref = reference_forward(x, params)
    assert out.shape == (2, N_CLASSES), out.shape
    assert jnp.allclose(out, ref, atol=1e-4, rtol=1e-4), "mismatch vs reference"

    print("KERNEL_OK")
</pallas_src>

<mosaic_0001>
module attributes {stable_mosaic.version = 11 : i64} {
  func.func @_mlp_kernel(%arg0: i32, %arg1: memref<8x896xf32, #tpu.memory_space<vmem>>, %arg2: memref<896x256xf32, #tpu.memory_space<vmem>>, %arg3: memref<1x256xf32, #tpu.memory_space<vmem>>, %arg4: memref<256x256xf32, #tpu.memory_space<vmem>>, %arg5: memref<1x256xf32, #tpu.memory_space<vmem>>, %arg6: memref<256x128xf32, #tpu.memory_space<vmem>>, %arg7: memref<1x128xf32, #tpu.memory_space<vmem>>, %arg8: memref<8x128xf32, #tpu.memory_space<vmem>>) attributes {dimension_semantics = [#tpu.dimension_semantics<parallel>], iteration_bounds = array<i64: 1>, scalar_prefetch = 0 : i64, scratch_operands = 0 : i64, tpu.core_type = #tpu.core_type<tc>, window_params = [{transform_indices = @transform_0, window_bounds = array<i64: 8, 896>}, {pipeline_mode = #tpu.pipeline_mode<synchronous>, transform_indices = @transform_1, window_bounds = array<i64: 896, 256>}, {pipeline_mode = #tpu.pipeline_mode<synchronous>, transform_indices = @transform_2, window_bounds = array<i64: 1, 256>}, {pipeline_mode = #tpu.pipeline_mode<synchronous>, transform_indices = @transform_3, window_bounds = array<i64: 256, 256>}, {pipeline_mode = #tpu.pipeline_mode<synchronous>, transform_indices = @transform_4, window_bounds = array<i64: 1, 256>}, {pipeline_mode = #tpu.pipeline_mode<synchronous>, transform_indices = @transform_5, window_bounds = array<i64: 256, 128>}, {pipeline_mode = #tpu.pipeline_mode<synchronous>, transform_indices = @transform_6, window_bounds = array<i64: 1, 128>}, {transform_indices = @transform_7, window_bounds = array<i64: 8, 128>}]} {
    %c0 = arith.constant 0 : index
    %c0_0 = arith.constant 0 : index
    %0 = vector.load %arg1[%c0, %c0_0] : memref<8x896xf32, #tpu.memory_space<vmem>>, vector<8x896xf32>
    %c0_1 = arith.constant 0 : index
    %c0_2 = arith.constant 0 : index
    %1 = vector.load %arg2[%c0_1, %c0_2] : memref<896x256xf32, #tpu.memory_space<vmem>>, vector<896x256xf32>
    %cst = arith.constant dense<0.000000e+00> : vector<8x256xf32>
    %2 = tpu.matmul %0, %1, %cst {dimension_numbers = #tpu.dot_dimension_numbers<[1], [0], [0], [1], [0, 0, 1, 1], [], []>} : vector<8x896xf32>, vector<896x256xf32>, vector<8x256xf32> -> vector<8x256xf32>
    %c0_3 = arith.constant 0 : index
    %c0_4 = arith.constant 0 : index
    %3 = vector.load %arg3[%c0_3, %c0_4] : memref<1x256xf32, #tpu.memory_space<vmem>>, vector<1x256xf32>
    %4 = vector.broadcast %3 : vector<1x256xf32> to vector<8x256xf32>
    %5 = arith.addf %2, %4 : vector<8x256xf32>
    %cst_5 = arith.constant 0.000000e+00 : f32
    %6 = vector.broadcast %cst_5 : f32 to vector<8x256xf32>
    %7 = arith.maximumf %5, %6 : vector<8x256xf32>
    %c0_6 = arith.constant 0 : index
    %c0_7 = arith.constant 0 : index
    %8 = vector.load %arg4[%c0_6, %c0_7] : memref<256x256xf32, #tpu.memory_space<vmem>>, vector<256x256xf32>
    %cst_8 = arith.constant dense<0.000000e+00> : vector<8x256xf32>
    %9 = tpu.matmul %7, %8, %cst_8 {dimension_numbers = #tpu.dot_dimension_numbers<[1], [0], [0], [1], [0, 0, 1, 1], [], []>} : vector<8x256xf32>, vector<256x256xf32>, vector<8x256xf32> -> vector<8x256xf32>
    %c0_9 = arith.constant 0 : index
    %c0_10 = arith.constant 0 : index
    %10 = vector.load %arg5[%c0_9, %c0_10] : memref<1x256xf32, #tpu.memory_space<vmem>>, vector<1x256xf32>
    %11 = vector.broadcast %10 : vector<1x256xf32> to vector<8x256xf32>
    %12 = arith.addf %9, %11 : vector<8x256xf32>
    %cst_11 = arith.constant 0.000000e+00 : f32
    %13 = vector.broadcast %cst_11 : f32 to vector<8x256xf32>
    %14 = arith.maximumf %12, %13 : vector<8x256xf32>
    %c0_12 = arith.constant 0 : index
    %c0_13 = arith.constant 0 : index
    %15 = vector.load %arg6[%c0_12, %c0_13] : memref<256x128xf32, #tpu.memory_space<vmem>>, vector<256x128xf32>
    %cst_14 = arith.constant dense<0.000000e+00> : vector<8x128xf32>
    %16 = tpu.matmul %14, %15, %cst_14 {dimension_numbers = #tpu.dot_dimension_numbers<[1], [0], [0], [1], [0, 0, 1, 1], [], []>} : vector<8x256xf32>, vector<256x128xf32>, vector<8x128xf32> -> vector<8x128xf32>
    %c0_15 = arith.constant 0 : index
    %c0_16 = arith.constant 0 : index
    %17 = vector.load %arg7[%c0_15, %c0_16] : memref<1x128xf32, #tpu.memory_space<vmem>>, vector<1x128xf32>
    %18 = vector.broadcast %17 : vector<1x128xf32> to vector<8x128xf32>
    %19 = arith.addf %16, %18 : vector<8x128xf32>
    %c0_17 = arith.constant 0 : index
    %c0_18 = arith.constant 0 : index
    %20 = vector.load %arg8[%c0_17, %c0_18] : memref<8x128xf32, #tpu.memory_space<vmem>>, vector<8x128xf32>
    tpu.vector_store %arg8[%c0_17, %c0_18], %19 {strides = array<i32>} : memref<8x128xf32, #tpu.memory_space<vmem>>, vector<8x128xf32>,
    return
  }
  func.func @transform_0(%arg0: i32) -> (i32, i32) {
    %c0_i32 = arith.constant 0 : i32
    %c0_i32_0 = arith.constant 0 : i32
    return %arg0, %c0_i32 : i32, i32
  }
  func.func @transform_1(%arg0: i32) -> (i32, i32) {
    %c0_i32 = arith.constant 0 : i32
    %c0_i32_0 = arith.constant 0 : i32
    %c0_i32_1 = arith.constant 0 : i32
    return %c0_i32, %c0_i32_0 : i32, i32
  }
  func.func @transform_2(%arg0: i32) -> (i32, i32) {
    %c0_i32 = arith.constant 0 : i32
    %c0_i32_0 = arith.constant 0 : i32
    %c0_i32_1 = arith.constant 0 : i32
    return %c0_i32, %c0_i32_0 : i32, i32
  }
  func.func @transform_3(%arg0: i32) -> (i32, i32) {
    %c0_i32 = arith.constant 0 : i32
    %c0_i32_0 = arith.constant 0 : i32
    %c0_i32_1 = arith.constant 0 : i32
    return %c0_i32, %c0_i32_0 : i32, i32
  }
  func.func @transform_4(%arg0: i32) -> (i32, i32) {
    %c0_i32 = arith.constant 0 : i32
    %c0_i32_0 = arith.constant 0 : i32
    %c0_i32_1 = arith.constant 0 : i32
    return %c0_i32, %c0_i32_0 : i32, i32
  }
  func.func @transform_5(%arg0: i32) -> (i32, i32) {
    %c0_i32 = arith.constant 0 : i32
    %c0_i32_0 = arith.constant 0 : i32
    %c0_i32_1 = arith.constant 0 : i32
    return %c0_i32, %c0_i32_0 : i32, i32
  }
  func.func @transform_6(%arg0: i32) -> (i32, i32) {
    %c0_i32 = arith.constant 0 : i32
    %c0_i32_0 = arith.constant 0 : i32
    %c0_i32_1 = arith.constant 0 : i32
    return %c0_i32, %c0_i32_0 : i32, i32
  }
  func.func @transform_7(%arg0: i32) -> (i32, i32) {
    %c0_i32 = arith.constant 0 : i32
    %c0_i32_0 = arith.constant 0 : i32
    return %arg0, %c0_i32 : i32, i32
  }
}

</mosaic_0001>

<bundles_post_ra>
// kernel: tpu_custom_call.1
= control target key start
LH: loop header
LB: loop body
LE: loop exit
PB: predicated region body
PF: predicated region fallthrough
CT: control target
= control target key end

     0   :  { %12 = vsyncpa [#allocation3], 0  ;;  %s1514_s0 = inlined_call_operand.hbm [shape: f32[8,896], index: 0, kind: input, shape index: {}]   ;;  %s1515_s1 = inlined_call_operand.hbm [shape: f32[896,256], index: 1, kind: input, shape index: {}]   ;;  %s1516_s2 = inlined_call_operand.vmem [shape: f32[1,256], index: 2, kind: input, shape index: {}]   ;;  %s1517_s3 = inlined_call_operand.hbm [shape: f32[256,256], index: 3, kind: input, shape index: {}]   ;;  %s1518_s4 = inlined_call_operand.vmem [shape: f32[1,256], index: 4, kind: input, shape index: {}]   ;;  %s1519_s5 = inlined_call_operand.hbm [shape: f32[256,128], index: 5, kind: input, shape index: {}]   ;;  %s1520_s6 = inlined_call_operand.vmem [shape: f32[1,128], index: 6, kind: input, shape index: {}]   ;;  %s1521_s7 = inlined_call_operand.hbm [shape: f32[8,128], index: 7, kind: output, shape index: {}]  }
   0x1   :  { %13 = vsyncpa [#allocation6], 0 }
   0x2   :  { %14 = vsyncpa [#allocation9], 0 }
   0x3   :  { %15 = vsyncpa [#allocation4], 0  ;;  %s1377_s24 = smov [#allocation5]   ;;  %s1259_s28 = scalar_lea.hbm %s1515_s1, 28672 }
   0x4   :  { %s31_s25 = sshll.u32 %s1377_s24, 4  ;;  %p1260_p0 = scmp.ne.s32.totalorder %s1515_s1, %s1259_s28  ;;  %s32_s25 = int_to_ptr.vmem [resolvable:$true] %s31_s25 }
   0x5   :  { %p1263_p1 = scmp.lt.u32.totalorder %s1259_s28, %s1515_s1 }
   0x7   :  { %p1265_p2 = pnand %p1263_p1, %p1260_p0 }
   0x9   :  { %1268 = shalt.err (!%p1265_p2)
}
   0xa   :  { %s1269_s10 = scalar_lea.vmem %s32_s25, 28672  ;;  %p1274_p4 = scmp.lt.s32.totalorder %s32_s25, %s32_s25 }
   0xb   :  { %p1270_p3 = scmp.ne.s32.totalorder %s32_s25, %s1269_s10  ;;  %p1275_p5 = scmp.lt.s32.totalorder %s1269_s10, %s1269_s10 }
   0xd   :  { %p1276_p6 = por %p1275_p5, %p1274_p4 }
   0xf   :  { %p1277_p7 = pnand %p1276_p6, %p1270_p3 }
  0x11   :  { %1280 = shalt.err (!%p1277_p7)
}
  0x12   :  { %s1378_s11 = smov 256   ;;  %s1379_s12 = smov 16  }
  0x13   :  { %37 = dma.hbm_to_vmem [thread:$0]  %s1515_s1, 28672, %s32_s25, [#allocation6], %s1378_s11, %s1378_s11, %s1379_s12  }
  0x14   :  { %s1380_s15 = smov [#allocation2]   ;;  %s1381_s17 = smov [#allocation7]  }
  0x15   :  { %s22_s16 = sshll.u32 %s1380_s15, 4  ;;  %s45_s18 = sshll.u32 %s1381_s17, 4  ;;  %s23_s16 = int_to_ptr.vmem [resolvable:$true] %s22_s16  ;;  %s46_s18 = int_to_ptr.vmem [resolvable:$true] %s45_s18 }
  0x16   :  { %s1281_s21 = scalar_lea.hbm %s1514_s0, 896 }
  0x17   :  { %p1282_p8 = scmp.ne.s32.totalorder %s1514_s0, %s1281_s21  ;;  %p1285_p9 = scmp.lt.u32.totalorder %s1281_s21, %s1514_s0 }
  0x19   :  { %p1287_p10 = pnand %p1285_p9, %p1282_p8 }
  0x1b   :  { %1290 = shalt.err (!%p1287_p10)
}
  0x1c   :  { %s1291_s1 = scalar_lea.vmem %s23_s16, 896  ;;  %p1296_p12 = scmp.lt.s32.totalorder %s23_s16, %s23_s16 }
  0x1d   :  { %p1292_p11 = scmp.ne.s32.totalorder %s23_s16, %s1291_s1  ;;  %p1297_p13 = scmp.lt.s32.totalorder %s1291_s1, %s1291_s1 }
  0x1f   :  { %p1298_p0 = por %p1297_p13, %p1296_p12 }
  0x21   :  { %p1299_p1 = pnand %p1298_p0, %p1292_p11 }
  0x23   :  { %1302 = shalt.err (!%p1299_p1)
}
  0x24   :  { %25 = dma.hbm_to_vmem [thread:$0]  %s1514_s0, 896, %s23_s16, [#allocation3]  }
  0x25   :  { %s1303_s30 = scalar_lea.hbm %s1517_s3, 8192 }
  0x26   :  { %p1304_p2 = scmp.ne.s32.totalorder %s1517_s3, %s1303_s30  ;;  %p1307_p3 = scmp.lt.u32.totalorder %s1303_s30, %s1517_s3 }
  0x28   :  { %p1309_p4 = pnand %p1307_p3, %p1304_p2 }
  0x2a   :  { %1312 = shalt.err (!%p1309_p4)
}
  0x2b   :  { %s1313_s14 = scalar_lea.vmem %s46_s18, 8192  ;;  %p1318_p6 = scmp.lt.s32.totalorder %s46_s18, %s46_s18 }
  0x2c   :  { %p1314_p5 = scmp.ne.s32.totalorder %s46_s18, %s1313_s14  ;;  %p1319_p7 = scmp.lt.s32.totalorder %s1313_s14, %s1313_s14 }
  0x2e   :  { %p1320_p8 = por %p1319_p7, %p1318_p6 }
  0x30   :  { %p1321_p9 = pnand %p1320_p8, %p1314_p5 }
  0x32   :  { %1324 = shalt.err (!%p1321_p9)
}
  0x33   :  { %51 = dma.hbm_to_vmem [thread:$0]  %s1517_s3, 8192, %s46_s18, [#allocation6], %s1378_s11, %s1378_s11, %s1379_s12  }
  0x34   :  { %s1382_s16 = smov [#allocation8]   ;;  %s1325_s21 = scalar_lea.hbm %s1519_s5, 4096 }
  0x35   :  { %s59_s17 = sshll.u32 %s1382_s16, 4  ;;  %p1326_p10 = scmp.ne.s32.totalorder %s1519_s5, %s1325_s21  ;;  %s60_s17 = int_to_ptr.vmem [resolvable:$true] %s59_s17 }
  0x36   :  { %p1329_p11 = scmp.lt.u32.totalorder %s1325_s21, %s1519_s5 }
  0x38   :  { %p1331_p12 = pnand %p1329_p11, %p1326_p10 }
  0x3a   :  { %1334 = shalt.err (!%p1331_p12)
}
  0x3b   :  { %s1335_s1 = scalar_lea.vmem %s60_s17, 4096  ;;  %p1340_p0 = scmp.lt.s32.totalorder %s60_s17, %s60_s17 }
  0x3c   :  { %p1336_p13 = scmp.ne.s32.totalorder %s60_s17, %s1335_s1  ;;  %p1341_p1 = scmp.lt.s32.totalorder %s1335_s1, %s1335_s1 }
  0x3e   :  { %p1342_p2 = por %p1341_p1, %p1340_p0 }
  0x40   :  { %p1343_p3 = pnand %p1342_p2, %p1336_p13 }
  0x42   :  { %1346 = shalt.err (!%p1343_p3)
}
  0x43   :  { %s1383_s3 = smov 128   ;;  %s1384_s11 = smov 8  }
  0x44   :  { %65 = dma.hbm_to_vmem [thread:$0]  %s1519_s5, 4096, %s60_s17, [#allocation9], %s1383_s3, %s1383_s3, %s1384_s11  }
  0x45   :  { %1369 = dma.done.wait [#allocation3], 896  }
  0x46   :  { %1370 = vsyncadd [#allocation3], 4294966400 }
  0x47   :  { %1371 = dma.done.wait [#allocation6], 36864  }
  0x48   :  { %1372 = vsyncadd [#allocation6], 4294930432 }
  0x49   :  { %1373 = dma.done.wait [#allocation9], 4096  }
  0x4a   :  { %1374 = vsyncadd [#allocation9], 4294963200  ;;  %v152_v0 = vld [vmem:[#allocation5 + $0x208] sm:$0xff]  ;;  %v154_v1 = vld [vmem:[#allocation5 + $0x218] sm:$0xff] }
  0x4b   :  { %v151_v2 = vld [vmem:[#allocation5 + $0x200] sm:$0xff]  ;;  %v985_v3 = vpack.c.bf16 %v154_v1, %v152_v0  ;;  %v153_v4 = vld [vmem:[#allocation5 + $0x210] sm:$0xff]  ;;  %v156_v5 = vld [vmem:[#allocation5 + $0x228] sm:$0xff] }
  0x4c   :  { %v158_v6 = vld [vmem:[#allocation5 + $0x238] sm:$0xff]  ;;  %v987_v7 = vpack.c.bf16 %v153_v4, %v151_v2  ;;  %v155_v9 = vld [vmem:[#allocation5 + $0x220] sm:$0xff]  ;;  %v157_v10 = vld [vmem:[#allocation5 + $0x230] sm:$0xff] }
  0x4d   :  { %v989_v8 = vpack.c.bf16 %v158_v6, %v156_v5  ;;  %v160_v11 = vld [vmem:[#allocation5 + $0x248] sm:$0xff]  ;;  %986 = vmatprep.subr.bf16.mxu0 %v985_v3  ;;  %v162_v12 = vld [vmem:[#allocation5 + $0x258] sm:$0xff]  ;;  %v991_v13 = vpack.c.bf16 %v157_v10, %v155_v9  ;;  %v159_v15 = vld [vmem:[#allocation5 + $0x240] sm:$0xff] }
  0x4e   :  { %988 = vmatpush1.bf16.msra.mxu0 %v987_v7  ;;  %v993_v14 = vpack.c.bf16 %v162_v12, %v160_v11  ;;  %v161_v16 = vld [vmem:[#allocation5 + $0x250] sm:$0xff]  ;;  %v164_v17 = vld [vmem:[#allocation5 + $0x268] sm:$0xff]  ;;  %v166_v18 = vld [vmem:[#allocation5 + $0x278] sm:$0xff] }
  0x4f   :  { %990 = vmatprep.subr.bf16.mxu0 %v989_v8  ;;  %v995_v19 = vpack.c.bf16 %v161_v16, %v159_v15  ;;  %v997_v20 = vpack.c.bf16 %v166_v18, %v164_v17  ;;  %v163_v21 = vld [vmem:[#allocation5 + $0x260] sm:$0xff]  ;;  %v165_v22 = vld [vmem:[#allocation5 + $0x270] sm:$0xff]  ;;  %v168_v23 = vld [vmem:[#allocation5 + $0x288] sm:$0xff] }
  0x50   :  { %v170_v24 = vld [vmem:[#allocation5 + $0x298] sm:$0xff]  ;;  %v999_v25 = vpack.c.bf16 %v165_v22, %v163_v21  ;;  %v167_v27 = vld [vmem:[#allocation5 + $0x280] sm:$0xff]  ;;  %v169_v28 = vld [vmem:[#allocation5 + $0x290] sm:$0xff] }
  0x51   :  { %v1001_v26 = vpack.c.bf16 %v170_v24, %v168_v23  ;;  %v172_v29 = vld [vmem:[#allocation5 + $0x2a8] sm:$0xff]  ;;  %v174_v30 = vld [vmem:[#allocation5 + $0x2b8] sm:$0xff]  ;;  %v1003_v31 = vpack.c.bf16 %v169_v28, %v167_v27  ;;  %v171_v33 = vld [vmem:[#allocation5 + $0x2a0] sm:$0xff] }
  0x52   :  { %992 = vmatpush1.bf16.msra.mxu0 %v991_v13  ;;  %v1005_v32 = vpack.c.bf16 %v174_v30, %v172_v29  ;;  %v173_v34 = vld [vmem:[#allocation5 + $0x2b0] sm:$0xff]  ;;  %v176_v35 = vld [vmem:[#allocation5 + $0x2c8] sm:$0xff]  ;;  %v178_v36 = vld [vmem:[#allocation5 + $0x2d8] sm:$0xff] }
  0x53   :  { %994 = vmatprep.subr.bf16.mxu0 %v993_v14  ;;  %v1007_v37 = vpack.c.bf16 %v173_v34, %v171_v33  ;;  %v1009_v38 = vpack.c.bf16 %v178_v36, %v176_v35  ;;  %v175_v39 = vld [vmem:[#allocation5 + $0x2c0] sm:$0xff]  ;;  %v177_v40 = vld [vmem:[#allocation5 + $0x2d0] sm:$0xff]  ;;  %v180_v42 = vld [vmem:[#allocation5 + $0x2e8] sm:$0xff] }
  0x54   :  { %v83_v41 = vld [vmem:[#allocation2 + $0x18] sm:$0xff]  ;;  %v182_v43 = vld [vmem:[#allocation5 + $0x2f8] sm:$0xff]  ;;  %v1011_v44 = vpack.c.bf16 %v177_v40, %v175_v39  ;;  %v181_v47 = vld [vmem:[#allocation5 + $0x2f0] sm:$0xff] }
  0x55   :  { %458 = vmatprep.mubr.f32.mxu0 %v83_v41  ;;  %v1013_v45 = vpack.c.bf16 %v182_v43, %v180_v42  ;;  %v179_v46 = vld [vmem:[#allocation5 + $0x2e0] sm:$0xff]  ;;  %v184_v48 = vld [vmem:[#allocation5 + $0x308] sm:$0xff]  ;;  %v186_v49 = vld [vmem:[#allocation5 + $0x318] sm:$0xff] }
  0x56   :  { %996 = vmatpush1.bf16.msra.mxu0 %v995_v19  ;;  %v1015_v50 = vpack.c.bf16 %v181_v47, %v179_v46  ;;  %v1017_v51 = vpack.c.bf16 %v186_v49, %v184_v48  ;;  %v183_v52 = vld [vmem:[#allocation5 + $0x300] sm:$0xff]  ;;  %v185_v53 = vld [vmem:[#allocation5 + $0x310] sm:$0xff]  ;;  %v188_v54 = vld [vmem:[#allocation5 + $0x328] sm:$0xff] }
  0x57   :  { %998 = vmatprep.subr.bf16.mxu0 %v997_v20  ;;  %v190_v55 = vld [vmem:[#allocation5 + $0x338] sm:$0xff]  ;;  %v1019_v56 = vpack.c.bf16 %v185_v53, %v183_v52  ;;  %v187_v57 = vld [vmem:[#allocation5 + $0x320] sm:$0xff]  ;;  %v88_v58 = vld [vmem:[#allocation5 + $0x8] sm:$0xff] }
  0x58   :  { %v90_v59 = vld [vmem:[#allocation5 + $0x18] sm:$0xff]  ;;  %v1021_v60 = vpack.c.bf16 %v190_v55, %v188_v54  ;;  %v189_v61 = vld [vmem:[#allocation5 + $0x330] sm:$0xff]  ;;  %v87_v63 = vld [vmem:[#allocation5] sm:$0xff] }
  0x59   :  { %v921_v62 = vpack.c.bf16 %v90_v59, %v88_v58  ;;  %v89_v0 = vld [vmem:[#allocation5 + $0x10] sm:$0xff]  ;;  %v192_v1 = vld [vmem:[#allocation5 + $0x348] sm:$0xff]  ;;  %v194_v2 = vld [vmem:[#allocation5 + $0x358] sm:$0xff]  ;;  %v1023_v6 = vpack.c.bf16 %v189_v61, %v187_v57 }
  0x5a   :  { %1000 = vmatpush1.bf16.msra.mxu0 %v999_v25  ;;  %v923_v3 = vpack.c.bf16 %v89_v0, %v87_v63  ;;  %v92_v4 = vld [vmem:[#allocation5 + $0x28] sm:$0xff]  ;;  %v94_v5 = vld [vmem:[#allocation5 + $0x38] sm:$0xff]  ;;  %v191_v7 = vld [vmem:[#allocation5 + $0x340] sm:$0xff]  ;;  %v1025_v11 = vpack.c.bf16 %v194_v2, %v192_v1 }
  0x5b   :  { %1002 = vmatprep.subr.bf16.mxu0 %v1001_v26  ;;  %922 = vmatprep.subr.bf16.mxu1 %v921_v62  ;;  %v925_v8 = vpack.c.bf16 %v94_v5, %v92_v4  ;;  %v91_v9 = vld [vmem:[#allocation5 + $0x20] sm:$0xff]  ;;  %v93_v10 = vld [vmem:[#allocation5 + $0x30] sm:$0xff]  ;;  %v96_v14 = vld [vmem:[#allocation5 + $0x48] sm:$0xff] }
  0x5c   :  { %924 = vmatpush1.bf16.msra.mxu1 %v923_v3  ;;  %v193_v12 = vld [vmem:[#allocation5 + $0x350] sm:$0xff]  ;;  %v927_v13 = vpack.c.bf16 %v93_v10, %v91_v9  ;;  %v98_v15 = vld [vmem:[#allocation5 + $0x58] sm:$0xff]  ;;  %v196_v16 = vld [vmem:[#allocation5 + $0x368] sm:$0xff] }
  0x5d   :  { %v198_v17 = vld [vmem:[#allocation5 + $0x378] sm:$0xff]  ;;  %926 = vmatprep.subr.bf16.mxu1 %v925_v8  ;;  %v929_v18 = vpack.c.bf16 %v98_v15, %v96_v14  ;;  %v95_v19 = vld [vmem:[#allocation5 + $0x40] sm:$0xff]  ;;  %v97_v20 = vld [vmem:[#allocation5 + $0x50] sm:$0xff]  ;;  %v1027_v21 = vpack.c.bf16 %v193_v12, %v191_v7 }
  0x5e   :  { %1004 = vmatpush1.bf16.msra.mxu0 %v1003_v31  ;;  %v195_v22 = vld [vmem:[#allocation5 + $0x360] sm:$0xff]  ;;  %v931_v23 = vpack.c.bf16 %v97_v20, %v95_v19  ;;  %v100_v24 = vld [vmem:[#allocation5 + $0x68] sm:$0xff]  ;;  %v102_v25 = vld [vmem:[#allocation5 + $0x78] sm:$0xff]  ;;  %v1029_v26 = vpack.c.bf16 %v198_v17, %v196_v16 }
  0x5f   :  { %1006 = vmatprep.subr.bf16.mxu0 %v1005_v32  ;;  %v197_v27 = vld [vmem:[#allocation5 + $0x370] sm:$0xff]  ;;  %v933_v28 = vpack.c.bf16 %v102_v25, %v100_v24  ;;  %v99_v29 = vld [vmem:[#allocation5 + $0x60] sm:$0xff]  ;;  %v200_v31 = vld [vmem:[#allocation5 + $0x388] sm:$0xff] }
  0x60   :  { %928 = vmatpush1.bf16.msra.mxu1 %v927_v13  ;;  %v101_v30 = vld [vmem:[#allocation5 + $0x70] sm:$0xff]  ;;  %v202_v32 = vld [vmem:[#allocation5 + $0x398] sm:$0xff]  ;;  %v104_v33 = vld [vmem:[#allocation5 + $0x88] sm:$0xff]  ;;  %v1031_v35 = vpack.c.bf16 %v197_v27, %v195_v22 }
  0x61   :  { %930 = vmatprep.subr.bf16.mxu1 %v929_v18  ;;  %v106_v34 = vld [vmem:[#allocation5 + $0x98] sm:$0xff]  ;;  %v199_v36 = vld [vmem:[#allocation5 + $0x380] sm:$0xff]  ;;  %v1033_v39 = vpack.c.bf16 %v202_v32, %v200_v31  ;;  %v204_v40 = vld [vmem:[#allocation5 + $0x3a8] sm:$0xff] }
  0x62   :  { %1008 = vmatpush1.bf16.msra.mxu0 %v1007_v37  ;;  %v201_v37 = vld [vmem:[#allocation5 + $0x390] sm:$0xff]  ;;  %v937_v41 = vpack.c.bf16 %v106_v34, %v104_v33  ;;  %v103_v42 = vld [vmem:[#allocation5 + $0x80] sm:$0xff]  ;;  %v110_v46 = vld [vmem:[#allocation5 + $0xb8] sm:$0xff] }
  0x63   :  { %1010 = vmatprep.subr.bf16.mxu0 %v1009_v38  ;;  %v935_v38 = vpack.c.bf16 %v101_v30, %v99_v29  ;;  %v105_v43 = vld [vmem:[#allocation5 + $0x90] sm:$0xff]  ;;  %v1035_v47 = vpack.c.bf16 %v201_v37, %v199_v36  ;;  %v203_v48 = vld [vmem:[#allocation5 + $0x3a0] sm:$0xff]  ;;  %v208_v52 = vld [vmem:[#allocation5 + $0x3c8] sm:$0xff] }
  0x64   :  { %932 = vmatpush1.bf16.msra.mxu1 %v931_v23  ;;  %v205_v49 = vld [vmem:[#allocation5 + $0x3b0] sm:$0xff]  ;;  %v107_v54 = vld [vmem:[#allocation5 + $0xa0] sm:$0xff]  ;;  %v112_v57 = vld [vmem:[#allocation5 + $0xc8] sm:$0xff] }
  0x65   :  { %934 = vmatprep.subr.bf16.mxu1 %v933_v28  ;;  %v109_v55 = vld [vmem:[#allocation5 + $0xb0] sm:$0xff]  ;;  %v114_v58 = vld [vmem:[#allocation5 + $0xd8] sm:$0xff]  ;;  %v1039_v59 = vpack.c.bf16 %v205_v49, %v203_v48  ;;  %v212_v0 = vld [vmem:[#allocation5 + $0x3e8] sm:$0xff] }
  0x66   :  { %1012 = vmatpush1.bf16.msra.mxu0 %v1011_v44  ;;  %v206_v44 = vld [vmem:[#allocation5 + $0x3b8] sm:$0xff]  ;;  %v209_v61 = vld [vmem:[#allocation5 + $0x3d0] sm:$0xff]  ;;  %v943_v62 = vpack.c.bf16 %v109_v55, %v107_v54  ;;  %v945_v1 = vpack.c.bf16 %v114_v58, %v112_v57  ;;  %v111_v2 = vld [vmem:[#allocation5 + $0xc0] sm:$0xff] }
  0x67   :  { %1014 = vmatprep.subr.bf16.mxu0 %v1013_v45  ;;  %v108_v45 = vld [vmem:[#allocation5 + $0xa8] sm:$0xff]  ;;  %v113_v3 = vld [vmem:[#allocation5 + $0xd0] sm:$0xff]  ;;  %v214_v4 = vld [vmem:[#allocation5 + $0x3f8] sm:$0xff] }
  0x68   :  { %936 = vmatpush1.bf16.msra.mxu1 %v935_v38  ;;  %v941_v53 = vpack.c.bf16 %v110_v46, %v108_v45  ;;  %v116_v5 = vld [vmem:[#allocation5 + $0xe8] sm:$0xff]  ;;  %v211_v8 = vld [vmem:[#allocation5 + $0x3e0] sm:$0xff]  ;;  %v213_v9 = vld [vmem:[#allocation5 + $0x3f0] sm:$0xff]  ;;  %v947_v10 = vpack.c.bf16 %v113_v3, %v111_v2 }
  0x69   :  { %938 = vmatprep.subr.bf16.mxu1 %v937_v41  ;;  %v216_v12 = vld [vmem:[#allocation5 + $0x408] sm:$0xff]  ;;  %v115_v14 = vld [vmem:[#allocation5 + $0xe0] sm:$0xff]  ;;  %v117_v15 = vld [vmem:[#allocation5 + $0xf0] sm:$0xff]  ;;  %v1047_v19 = vpack.c.bf16 %v213_v9, %v211_v8 }
  0x6a   :  { %1016 = vmatpush1.bf16.msra.mxu0 %v1015_v50  ;;  %v939_v50 = vpack.c.bf16 %v105_v43, %v103_v42  ;;  %v218_v16 = vld [vmem:[#allocation5 + $0x418] sm:$0xff]  ;;  %v120_v17 = vld [vmem:[#allocation5 + $0x108] sm:$0xff]  ;;  %v215_v20 = vld [vmem:[#allocation5 + $0x400] sm:$0xff] }
  0x6b   :  { %1018 = vmatprep.subr.bf16.mxu0 %v1017_v51  ;;  %v1037_v51 = vpack.c.bf16 %v206_v44, %v204_v40  ;;  %v122_v18 = vld [vmem:[#allocation5 + $0x118] sm:$0xff]  ;;  %v1049_v22 = vpack.c.bf16 %v218_v16, %v216_v12  ;;  %v217_v23 = vld [vmem:[#allocation5 + $0x410] sm:$0xff]  ;;  %v119_v25 = vld [vmem:[#allocation5 + $0x100] sm:$0xff] }
  0x6c   :  { %940 = vmatpush1.bf16.msra.mxu1 %v939_v50  ;;  %v953_v24 = vpack.c.bf16 %v122_v18, %v120_v17  ;;  %v220_v27 = vld [vmem:[#allocation5 + $0x428] sm:$0xff]  ;;  %v222_v28 = vld [vmem:[#allocation5 + $0x438] sm:$0xff]  ;;  %v1051_v32 = vpack.c.bf16 %v217_v23, %v215_v20  ;;  %v219_v33 = vld [vmem:[#allocation5 + $0x420] sm:$0xff] }
  0x6d   :  { %942 = vmatprep.subr.bf16.mxu1 %v941_v53  ;;  %v82_v29 = vld [vmem:[#allocation2 + $0x10] sm:$0xff]  ;;  %v124_v30 = vld [vmem:[#allocation5 + $0x128] sm:$0xff]  ;;  %v221_v34 = vld [vmem:[#allocation5 + $0x430] sm:$0xff]  ;;  %v1053_v37 = vpack.c.bf16 %v222_v28, %v220_v27 }
  0x6e   :  { %1020 = vmatpush1.bf16.msra.mxu0 %v1019_v56  ;;  %v210_v56 = vld [vmem:[#allocation5 + $0x3d8] sm:$0xff]  ;;  %v125_v40 = vld [vmem:[#allocation5 + $0x130] sm:$0xff]  ;;  %v128_v43 = vld [vmem:[#allocation5 + $0x148] sm:$0xff]  ;;  %v1055_v45 = vpack.c.bf16 %v221_v34, %v219_v33 }
  0x6f   :  { %1022 = vmatprep.subr.bf16.mxu0 %v1021_v60  ;;  %v207_v60 = vld [vmem:[#allocation5 + $0x3c0] sm:$0xff]  ;;  %v1041_v63 = vpack.c.bf16 %v210_v56, %v208_v52  ;;  %v126_v31 = vld [vmem:[#allocation5 + $0x138] sm:$0xff]  ;;  %v85_v41 = vld [vmem:[#allocation2 + $0x28] sm:$0xff] }
  0x70   :  { %v1043_v7 = vpack.c.bf16 %v209_v61, %v207_v60  ;;  %944 = vmatpush1.bf16.msra.mxu1 %v943_v62  ;;  %v226_v38 = vld [vmem:[#allocation5 + $0x458] sm:$0xff]  ;;  %v957_v42 = vpack.c.bf16 %v126_v31, %v124_v30  ;;  %v223_v46 = vld [vmem:[#allocation5 + $0x440] sm:$0xff]  ;;  %v228_v50 = vld [vmem:[#allocation5 + $0x468] sm:$0xff] }
  0x71   :  { %946 = vmatprep.subr.bf16.mxu1 %v945_v1  ;;  %v130_v44 = vld [vmem:[#allocation5 + $0x158] sm:$0xff]  ;;  %v127_v52 = vld [vmem:[#allocation5 + $0x140] sm:$0xff]  ;;  %v129_v53 = vld [vmem:[#allocation5 + $0x150] sm:$0xff] }
  0x72   :  { %1024 = vmatpush1.bf16.msra.mxu0 %v1023_v6  ;;  %v118_v6 = vld [vmem:[#allocation5 + $0xf8] sm:$0xff]  ;;  %v132_v55 = vld [vmem:[#allocation5 + $0x168] sm:$0xff]  ;;  %v227_v58 = vld [vmem:[#allocation5 + $0x460] sm:$0xff]  ;;  %v963_v61 = vpack.c.bf16 %v129_v53, %v127_v52 }
  0x73   :  { %1026 = vmatprep.subr.bf16.mxu0 %v1025_v11  ;;  %v1045_v11 = vpack.c.bf16 %v214_v4, %v212_v0  ;;  %v949_v13 = vpack.c.bf16 %v118_v6, %v116_v5  ;;  %v230_v54 = vld [vmem:[#allocation5 + $0x478] sm:$0xff]  ;;  %v232_v60 = vld [vmem:[#allocation5 + $0x488] sm:$0xff]  ;;  %v131_v1 = vld [vmem:[#allocation5 + $0x160] sm:$0xff] }
  0x74   :  { %948 = vmatpush1.bf16.msra.mxu1 %v947_v10  ;;  %v134_v56 = vld [vmem:[#allocation5 + $0x178] sm:$0xff]  ;;  %v1061_v62 = vpack.c.bf16 %v230_v54, %v228_v50  ;;  %v133_v2 = vld [vmem:[#allocation5 + $0x170] sm:$0xff]  ;;  %v136_v3 = vld [vmem:[#allocation5 + $0x188] sm:$0xff] }
  0x75   :  { %950 = vmatprep.subr.bf16.mxu1 %v949_v13  ;;  %v965_v0 = vpack.c.bf16 %v134_v56, %v132_v55  ;;  %v138_v4 = vld [vmem:[#allocation5 + $0x198] sm:$0xff]  ;;  %v81_v5 = vld [vmem:[#allocation2 + $0x8] sm:$0xff]  ;;  %v967_v9 = vpack.c.bf16 %v133_v2, %v131_v1  ;;  %v135_v13 = vld [vmem:[#allocation5 + $0x180] sm:$0xff] }
  0x76   :  { %1028 = vmatpush1.bf16.msra.mxu0 %v1027_v21  ;;  %v951_v21 = vpack.c.bf16 %v117_v15, %v115_v14  ;;  %387 = vmatprep.mubr.f32.mxu1 %v81_v5  ;;  %v233_v8 = vld [vmem:[#allocation5 + $0x490] sm:$0xff]  ;;  %v969_v12 = vpack.c.bf16 %v138_v4, %v136_v3  ;;  %v238_v15 = vld [vmem:[#allocation5 + $0x4b8] sm:$0xff]  ;;  %v140_v16 = vld [vmem:[#allocation5 + $0x1a8] sm:$0xff] }
  0x77   :  { %1030 = vmatprep.subr.bf16.mxu0 %v1029_v26  ;;  %v121_v26 = vld [vmem:[#allocation5 + $0x110] sm:$0xff]  ;;  %v142_v17 = vld [vmem:[#allocation5 + $0x1b8] sm:$0xff]  ;;  %v240_v23 = vld [vmem:[#allocation5 + $0x4c8] sm:$0xff] }
  0x78   :  { %952 = vmatpush1.bf16.msra.mxu1 %v951_v21  ;;  %v955_v36 = vpack.c.bf16 %v121_v26, %v119_v25  ;;  %v137_v14 = vld [vmem:[#allocation5 + $0x190] sm:$0xff]  ;;  %v139_v25 = vld [vmem:[#allocation5 + $0x1a0] sm:$0xff]  ;;  %v242_v27 = vld [vmem:[#allocation5 + $0x4d8] sm:$0xff] }
  0x79   :  { %954 = vmatprep.subr.bf16.mxu1 %v953_v24  ;;  %v237_v20 = vld [vmem:[#allocation5 + $0x4b0] sm:$0xff]  ;;  %v971_v21 = vpack.c.bf16 %v137_v14, %v135_v13  ;;  %v973_v24 = vpack.c.bf16 %v142_v17, %v140_v16  ;;  %v144_v28 = vld [vmem:[#allocation5 + $0x1c8] sm:$0xff]  ;;  %v239_v31 = vld [vmem:[#allocation5 + $0x4c0] sm:$0xff]  ;;  %v1073_v34 = vpack.c.bf16 %v242_v27, %v240_v23 }
  0x7a   :  { %1032 = vmatpush1.bf16.msra.mxu0 %v1031_v35  ;;  %v224_v35 = vld [vmem:[#allocation5 + $0x448] sm:$0xff]  ;;  %v141_v26 = vld [vmem:[#allocation5 + $0x1b0] sm:$0xff]  ;;  %v612_v53 = vld [vmem:[#allocation7 + $0x18] sm:$0xff] }
  0x7b   :  { %1034 = vmatprep.subr.bf16.mxu0 %v1033_v39  ;;  %v123_v39 = vld [vmem:[#allocation5 + $0x120] sm:$0xff]  ;;  %v1057_v49 = vpack.c.bf16 %v226_v38, %v224_v35  ;;  %v975_v33 = vpack.c.bf16 %v141_v26, %v139_v25  ;;  %v244_v35 = vld [vmem:[#allocation5 + $0x4e8] sm:$0xff]  ;;  %v145_v38 = vld [vmem:[#allocation5 + $0x1d0] sm:$0xff] }
  0x7c   :  { %956 = vmatpush1.bf16.msra.mxu1 %v955_v36  ;;  %v959_v48 = vpack.c.bf16 %v125_v40, %v123_v39  ;;  %v246_v39 = vld [vmem:[#allocation5 + $0x4f8] sm:$0xff]  ;;  %v148_v40 = vld [vmem:[#allocation5 + $0x1e8] sm:$0xff]  ;;  %v149_v50 = vld [vmem:[#allocation5 + $0x1f0] sm:$0xff] }
  0x7d   :  { %958 = vmatprep.subr.bf16.mxu1 %v957_v42  ;;  %v610_v52 = vld [vmem:[#allocation7 + $0x8] sm:$0xff]  ;;  %v247_v55 = vld [vmem:[#allocation5 + $0x500] sm:$0xff]  ;;  %v249_v56 = vld [vmem:[#allocation5 + $0x510] sm:$0xff] }
  0x7e   :  { %1036 = vmatpush1.bf16.msra.mxu0 %v1035_v47  ;;  %v225_v47 = vld [vmem:[#allocation5 + $0x450] sm:$0xff]  ;;  %v616_v1 = vld [vmem:[#allocation7 + $0x38] sm:$0xff]  ;;  %v1083_v2 = vpack.c.bf16 %v249_v56, %v247_v55  ;;  %v251_v3 = vld [vmem:[#allocation5 + $0x520] sm:$0xff] }
  0x7f   :  { %1038 = vmatprep.subr.bf16.mxu0 %v1037_v51  ;;  %v961_v51 = vpack.c.bf16 %v130_v44, %v128_v43  ;;  %v1059_v57 = vpack.c.bf16 %v225_v47, %v223_v46  ;;  %v243_v43 = vld [vmem:[#allocation5 + $0x4e0] sm:$0xff]  ;;  %v245_v44 = vld [vmem:[#allocation5 + $0x4f0] sm:$0xff]  ;;  %v1077_v46 = vpack.c.bf16 %v246_v39, %v244_v35  ;;  %v248_v47 = vld [vmem:[#allocation5 + $0x508] sm:$0xff] }
  0x80   :  { %960 = vmatpush1.bf16.msra.mxu1 %v959_v48  ;;  %v1079_v54 = vpack.c.bf16 %v245_v44, %v243_v43  ;;  %v253_v4 = vld [vmem:[#allocation5 + $0x530] sm:$0xff]  ;;  %v80_v5 = vld [vmem:[#allocation2] sm:$0xff]  ;;  %v620_v14 = vld [vmem:[#allocation7 + $0x58] sm:$0xff] }
  0x81   :  { %962 = vmatprep.subr.bf16.mxu1 %v961_v51  ;;  %v250_v51 = vld [vmem:[#allocation5 + $0x518] sm:$0xff]  ;;  %v618_v13 = vld [vmem:[#allocation7 + $0x48] sm:$0xff]  ;;  %v255_v16 = vld [vmem:[#allocation5 + $0x540] sm:$0xff] }
  0x82   :  { %1040 = vmatpush1.bf16.msra.mxu0 %v1039_v59  ;;  %v229_v59 = vld [vmem:[#allocation5 + $0x470] sm:$0xff]  ;;  %v622_v25 = vld [vmem:[#allocation7 + $0x68] sm:$0xff]  ;;  %v624_v26 = vld [vmem:[#allocation7 + $0x78] sm:$0xff] }
  0x83   :  { %1042 = vmatprep.subr.bf16.mxu0 %v1041_v63  ;;  %v234_v63 = vld [vmem:[#allocation5 + $0x498] sm:$0xff]  ;;  %v1063_v6 = vpack.c.bf16 %v229_v59, %v227_v58  ;;  %v1081_v58 = vpack.c.bf16 %v250_v51, %v248_v47  ;;  %v252_v59 = vld [vmem:[#allocation5 + $0x528] sm:$0xff]  ;;  %v257_v17 = vld [vmem:[#allocation5 + $0x550] sm:$0xff] }
  0x84   :  { %964 = vmatpush1.bf16.msra.mxu1 %v963_v61  ;;  %v1065_v10 = vpack.c.bf16 %v234_v63, %v232_v60  ;;  %v1145_v60 = vpack.c.bf16 %v612_v53, %v610_v52  ;;  %v609_v61 = vld [vmem:[#allocation7] sm:$0xff]  ;;  %v254_v63 = vld [vmem:[#allocation5 + $0x538] sm:$0xff]  ;;  %v619_v23 = vld [vmem:[#allocation7 + $0x50] sm:$0xff]  ;;  %v1091_v27 = vpack.c.bf16 %v257_v17, %v255_v16 }
  0x85   :  { %966 = vmatprep.subr.bf16.mxu1 %v965_v0  ;;  %v614_v0 = vld [vmem:[#allocation7 + $0x28] sm:$0xff]  ;;  %v623_v35 = vld [vmem:[#allocation7 + $0x70] sm:$0xff]  ;;  %v267_v52 = vld [vmem:[#allocation5 + $0x5a0] sm:$0xff] }
  0x86   :  { %1044 = vmatpush1.bf16.msra.mxu0 %v1043_v7  ;;  %v231_v7 = vld [vmem:[#allocation5 + $0x480] sm:$0xff]  ;;  %v268_v44 = vld [vmem:[#allocation5 + $0x5a8] sm:$0xff]  ;;  %v627_v47 = vld [vmem:[#allocation7 + $0x90] sm:$0xff] }
  0x87   :  { %1046 = vmatprep.subr.bf16.mxu0 %v1045_v11  ;;  %v236_v11 = vld [vmem:[#allocation5 + $0x4a8] sm:$0xff]  ;;  %v1067_v18 = vpack.c.bf16 %v233_v8, %v231_v7  ;;  %v1085_v7 = vpack.c.bf16 %v254_v63, %v252_v59  ;;  %v269_v53 = vld [vmem:[#allocation5 + $0x5b0] sm:$0xff] }
  0x88   :  { %968 = vmatpush1.bf16.msra.mxu1 %v967_v9  ;;  %v256_v8 = vld [vmem:[#allocation5 + $0x548] sm:$0xff]  ;;  %v1149_v9 = vpack.c.bf16 %v616_v1, %v614_v0  ;;  %v631_v59 = vld [vmem:[#allocation7 + $0xb0] sm:$0xff]  ;;  %v1103_v63 = vpack.c.bf16 %v269_v53, %v267_v52  ;;  %v271_v0 = vld [vmem:[#allocation5 + $0x5c0] sm:$0xff] }
  0x89   :  { %970 = vmatprep.subr.bf16.mxu1 %v969_v12  ;;  %v258_v12 = vld [vmem:[#allocation5 + $0x558] sm:$0xff]  ;;  %v272_v56 = vld [vmem:[#allocation5 + $0x5c8] sm:$0xff]  ;;  %v273_v1 = vld [vmem:[#allocation5 + $0x5d0] sm:$0xff] }
  0x8a   :  { %1048 = vmatpush1.bf16.msra.mxu0 %v1047_v19  ;;  %v235_v19 = vld [vmem:[#allocation5 + $0x4a0] sm:$0xff]  ;;  %v280_v16 = vld [vmem:[#allocation5 + $0x608] sm:$0xff]  ;;  %v289_v52 = vld [vmem:[#allocation5 + $0x650] sm:$0xff] }
  0x8b   :  { %1050 = vmatprep.subr.bf16.mxu0 %v1049_v22  ;;  %v1069_v22 = vpack.c.bf16 %v238_v15, %v236_v11  ;;  %v1071_v30 = vpack.c.bf16 %v237_v20, %v235_v19  ;;  %v615_v11 = vld [vmem:[#allocation7 + $0x30] sm:$0xff]  ;;  %v1087_v15 = vpack.c.bf16 %v253_v4, %v251_v3  ;;  %v1089_v19 = vpack.c.bf16 %v258_v12, %v256_v8  ;;  %v260_v20 = vld [vmem:[#allocation5 + $0x568] sm:$0xff]  ;;  %v278_v8 = vld [vmem:[#allocation5 + $0x5f8] sm:$0xff] }
  0x8c   :  { %972 = vmatpush1.bf16.msra.mxu1 %v971_v21  ;;  %v1153_v21 = vpack.c.bf16 %v620_v14, %v618_v13  ;;  %v276_v4 = vld [vmem:[#allocation5 + $0x5e8] sm:$0xff]  ;;  %v275_v12 = vld [vmem:[#allocation5 + $0x5e0] sm:$0xff]  ;;  %v277_v13 = vld [vmem:[#allocation5 + $0x5f0] sm:$0xff] }
  0x8d   :  { %459 = vmatmul.mubr.f32.vlgmr.msra.gmra.mrb[0].mxu0 %v82_v29  ;;  %v146_v29 = vld [vmem:[#allocation5 + $0x1d8] sm:$0xff]  ;;  %974 = vmatprep.subr.bf16.mxu1 %v973_v24  ;;  %v292_v53 = vld [vmem:[#allocation5 + $0x668] sm:$0xff] }
  0x8e   :  { %1052 = vmatpush1.bf16.msra.mxu0 %v1051_v32  ;;  %529 = vmatprep.mubr.f32.mxu0 %v85_v41  ;;  %v241_v32 = vld [vmem:[#allocation5 + $0x4d0] sm:$0xff]  ;;  %v977_v36 = vpack.c.bf16 %v146_v29, %v144_v28  ;;  %v150_v41 = vld [vmem:[#allocation5 + $0x1f8] sm:$0xff]  ;;  %v259_v28 = vld [vmem:[#allocation5 + $0x560] sm:$0xff] }
  0x8f   :  { %1054 = vmatprep.subr.bf16.mxu0 %v1053_v37  ;;  %v143_v37 = vld [vmem:[#allocation5 + $0x1c0] sm:$0xff]  ;;  %v1075_v42 = vpack.c.bf16 %v241_v32, %v239_v31  ;;  %v981_v48 = vpack.c.bf16 %v150_v41, %v148_v40  ;;  %v262_v24 = vld [vmem:[#allocation5 + $0x578] sm:$0xff]  ;;  %v261_v29 = vld [vmem:[#allocation5 + $0x570] sm:$0xff] }
  0x90   :  { %976 = vmatpush1.bf16.msra.mxu1 %v975_v33  ;;  %v1093_v31 = vpack.c.bf16 %v262_v24, %v260_v20  ;;  %v264_v32 = vld [vmem:[#allocation5 + $0x588] sm:$0xff]  ;;  %v1157_v33 = vpack.c.bf16 %v624_v26, %v622_v25  ;;  %v1095_v39 = vpack.c.bf16 %v261_v29, %v259_v28  ;;  %v263_v40 = vld [vmem:[#allocation5 + $0x580] sm:$0xff]  ;;  %v265_v41 = vld [vmem:[#allocation5 + $0x590] sm:$0xff] }
  0x91   :  { %978 = vmatprep.subr.bf16.mxu1 %v977_v36  ;;  %v266_v36 = vld [vmem:[#allocation5 + $0x598] sm:$0xff]  ;;  %v1099_v51 = vpack.c.bf16 %v265_v41, %v263_v40  ;;  %v279_v26 = vld [vmem:[#allocation5 + $0x600] sm:$0xff]  ;;  %v284_v28 = vld [vmem:[#allocation5 + $0x628] sm:$0xff] }
  0x92   :  { %1056 = vmatpush1.bf16.msra.mxu0 %v1055_v45  ;;  %v979_v45 = vpack.c.bf16 %v145_v38, %v143_v37  ;;  %v626_v37 = vld [vmem:[#allocation7 + $0x88] sm:$0xff]  ;;  %v628_v38 = vld [vmem:[#allocation7 + $0x98] sm:$0xff]  ;;  %v1097_v43 = vpack.c.bf16 %v266_v36, %v264_v32  ;;  %v643_v32 = vld [vmem:[#allocation7 + $0x110] sm:$0xff] }
  0x93   :  { %1058 = vmatprep.subr.bf16.mxu0 %v1057_v49  ;;  %v147_v49 = vld [vmem:[#allocation5 + $0x1e0] sm:$0xff]  ;;  %v282_v20 = vld [vmem:[#allocation5 + $0x618] sm:$0xff]  ;;  %v288_v40 = vld [vmem:[#allocation5 + $0x648] sm:$0xff] }
  0x94   :  { %980 = vmatpush1.bf16.msra.mxu1 %v979_v45  ;;  %v1161_v45 = vpack.c.bf16 %v628_v38, %v626_v37  ;;  %v1113_v25 = vpack.c.bf16 %v282_v20, %v280_v16  ;;  %v283_v38 = vld [vmem:[#allocation5 + $0x620] sm:$0xff]  ;;  %v664_v20 = vld [vmem:[#allocation7 + $0x1b8] sm:$0xff] }
  0x95   :  { %982 = vmatprep.subr.bf16.mxu1 %v981_v48  ;;  %v270_v48 = vld [vmem:[#allocation5 + $0x5b8] sm:$0xff] }
  0x96   :  { %1060 = vmatpush1.bf16.msra.mxu0 %v1059_v57  ;;  %v983_v57 = vpack.c.bf16 %v149_v50, %v147_v49  ;;  %v630_v49 = vld [vmem:[#allocation7 + $0xa8] sm:$0xff]  ;;  %v632_v50 = vld [vmem:[#allocation7 + $0xb8] sm:$0xff]  ;;  %v1101_v55 = vpack.c.bf16 %v270_v48, %v268_v44  ;;  %v645_v44 = vld [vmem:[#allocation7 + $0x120] sm:$0xff] }
  0x97   :  { %1062 = vmatprep.subr.bf16.mxu0 %v1061_v62  ;;  %v611_v62 = vld [vmem:[#allocation7 + $0x10] sm:$0xff] }
  0x98   :  { %984 = vmatpush1.bf16.msra.mxu1 %v983_v57  ;;  %v1165_v57 = vpack.c.bf16 %v632_v50, %v630_v49  ;;  %v1385_v49 = vmov 0.0  }
  0x99   :  { %1146 = vmatprep.subr.bf16.mxu1 %v1145_v60  ;;  %v274_v60 = vld [vmem:[#allocation5 + $0x5d8] sm:$0xff] }
  0x9a   :  { %1064 = vmatpush1.bf16.msra.mxu0 %v1063_v6  ;;  %v1147_v6 = vpack.c.bf16 %v611_v62, %v609_v61  ;;  %v634_v61 = vld [vmem:[#allocation7 + $0xc8] sm:$0xff]  ;;  %v636_v62 = vld [vmem:[#allocation7 + $0xd8] sm:$0xff]  ;;  %v1105_v3 = vpack.c.bf16 %v274_v60, %v272_v56 }
  0x9b   :  { %1066 = vmatprep.subr.bf16.mxu0 %v1065_v10  ;;  %v613_v10 = vld [vmem:[#allocation7 + $0x20] sm:$0xff]  ;;  %388 = vmatmul.mubr.f32.vlgmr.msra.gmra.mrb[0].mxu1 %v80_v5  ;;  %v1169_v5 = vpack.c.bf16 %v636_v62, %v634_v61  ;;  %v656_v60 = vld [vmem:[#allocation7 + $0x178] sm:$0xff] }
  0x9c   :  { %1148 = vmatpush1.bf16.msra.mxu1 %v1147_v6  ;;  %v633_v6 = vld [vmem:[#allocation7 + $0xc0] sm:$0xff] }
  0x9d   :  { %1150 = vmatprep.subr.bf16.mxu1 %v1149_v9  ;;  %v638_v9 = vld [vmem:[#allocation7 + $0xe8] sm:$0xff] }
  0x9e   :  { %1068 = vmatpush1.bf16.msra.mxu0 %v1067_v18  ;;  %v1151_v18 = vpack.c.bf16 %v615_v11, %v613_v10  ;;  %v640_v10 = vld [vmem:[#allocation7 + $0xf8] sm:$0xff]  ;;  %v1107_v11 = vpack.c.bf16 %v273_v1, %v271_v0  ;;  %v293_v0 = vld [vmem:[#allocation5 + $0x670] sm:$0xff]  ;;  %v296_v1 = vld [vmem:[#allocation5 + $0x688] sm:$0xff] }
  0x9f   :  { %1070 = vmatprep.subr.bf16.mxu0 %v1069_v22  ;;  %v617_v22 = vld [vmem:[#allocation7 + $0x40] sm:$0xff]  ;;  %v1173_v17 = vpack.c.bf16 %v640_v10, %v638_v9 }
  0xa0   :  { %1152 = vmatpush1.bf16.msra.mxu1 %v1151_v18  ;;  %v637_v18 = vld [vmem:[#allocation7 + $0xe0] sm:$0xff] }
  0xa1   :  { %1154 = vmatprep.subr.bf16.mxu1 %v1153_v21  ;;  %v642_v21 = vld [vmem:[#allocation7 + $0x108] sm:$0xff] }
  0xa2   :  { %1072 = vmatpush1.bf16.msra.mxu0 %v1071_v30  ;;  %v1155_v30 = vpack.c.bf16 %v619_v23, %v617_v22  ;;  %v644_v22 = vld [vmem:[#allocation7 + $0x118] sm:$0xff]  ;;  %v1111_v23 = vpack.c.bf16 %v277_v13, %v275_v12  ;;  %v297_v12 = vld [vmem:[#allocation5 + $0x690] sm:$0xff]  ;;  %v300_v13 = vld [vmem:[#allocation5 + $0x6a8] sm:$0xff] }
  0xa3   :  { %1074 = vmatprep.subr.bf16.mxu0 %v1073_v34  ;;  %v621_v34 = vld [vmem:[#allocation7 + $0x60] sm:$0xff]  ;;  %v1177_v29 = vpack.c.bf16 %v644_v22, %v642_v21 }
  0xa4   :  { %1156 = vmatpush1.bf16.msra.mxu1 %v1155_v30  ;;  %v286_v30 = vld [vmem:[#allocation5 + $0x638] sm:$0xff] }
  0xa5   :  { %1158 = vmatprep.subr.bf16.mxu1 %v1157_v33  ;;  %v646_v33 = vld [vmem:[#allocation7 + $0x128] sm:$0xff]  ;;  %v1117_v37 = vpack.c.bf16 %v286_v30, %v284_v28  ;;  %v663_v30 = vld [vmem:[#allocation7 + $0x1b0] sm:$0xff] }
  0xa6   :  { %1076 = vmatpush1.bf16.msra.mxu0 %v1075_v42  ;;  %v1159_v42 = vpack.c.bf16 %v623_v35, %v621_v34  ;;  %v648_v34 = vld [vmem:[#allocation7 + $0x138] sm:$0xff]  ;;  %v84_v35 = vld [vmem:[#allocation2 + $0x20] sm:$0xff] }
  0xa7   :  { %1078 = vmatprep.subr.bf16.mxu0 %v1077_v46  ;;  %v625_v46 = vld [vmem:[#allocation7 + $0x80] sm:$0xff] }
  0xa8   :  { %1160 = vmatpush1.bf16.msra.mxu1 %v1159_v42  ;;  %v290_v42 = vld [vmem:[#allocation5 + $0x658] sm:$0xff] }
  0xa9   :  { %1162 = vmatprep.subr.bf16.mxu1 %v1161_v45  ;;  %v647_v45 = vld [vmem:[#allocation7 + $0x130] sm:$0xff]  ;;  %v1121_v50 = vpack.c.bf16 %v290_v42, %v288_v40  ;;  %v307_v40 = vld [vmem:[#allocation5 + $0x6e0] sm:$0xff] }
  0xaa   :  { %1080 = vmatpush1.bf16.msra.mxu0 %v1079_v54  ;;  %v1163_v54 = vpack.c.bf16 %v627_v47, %v625_v46  ;;  %v650_v46 = vld [vmem:[#allocation7 + $0x148] sm:$0xff]  ;;  %v652_v47 = vld [vmem:[#allocation7 + $0x158] sm:$0xff] }
  0xab   :  { %1082 = vmatprep.subr.bf16.mxu0 %v1081_v58  ;;  %v629_v58 = vld [vmem:[#allocation7 + $0xa0] sm:$0xff]  ;;  %v1185_v56 = vpack.c.bf16 %v652_v47, %v650_v46 }
  0xac   :  { %1164 = vmatpush1.bf16.msra.mxu1 %v1163_v54  ;;  %v1183_v54 = vpack.c.bf16 %v647_v45, %v645_v44  ;;  %v666_v44 = vld [vmem:[#allocation7 + $0x1c8] sm:$0xff]  ;;  %v668_v45 = vld [vmem:[#allocation7 + $0x1d8] sm:$0xff]  ;;  %v665_v47 = vld [vmem:[#allocation7 + $0x1c0] sm:$0xff] }
  0xad   :  { %1166 = vmatprep.subr.bf16.mxu1 %v1165_v57  ;;  %v649_v57 = vld [vmem:[#allocation7 + $0x140] sm:$0xff]  ;;  %v1201_v46 = vpack.c.bf16 %v668_v45, %v666_v44  ;;  %v787_v45 = vld [vmem:[#allocation8 + $0xe8] sm:$0xff] }
  0xae   :  { %1084 = vmatpush1.bf16.msra.mxu0 %v1083_v2  ;;  %v1167_v2 = vpack.c.bf16 %v631_v59, %v629_v58  ;;  %v651_v58 = vld [vmem:[#allocation7 + $0x150] sm:$0xff]  ;;  %v654_v59 = vld [vmem:[#allocation7 + $0x168] sm:$0xff]  ;;  %v786_v44 = vld [vmem:[#allocation8 + $0xe0] sm:$0xff] }
  0xaf   :  { %1086 = vmatprep.subr.bf16.mxu0 %v1085_v7  ;;  %v635_v7 = vld [vmem:[#allocation7 + $0xd0] sm:$0xff] }
  0xb0   :  { %1168 = vmatpush1.bf16.msra.mxu1 %v1167_v2  ;;  %v1171_v14 = vpack.c.bf16 %v635_v7, %v633_v6  ;;  %v1187_v2 = vpack.c.bf16 %v651_v58, %v649_v57  ;;  %v655_v6 = vld [vmem:[#allocation7 + $0x170] sm:$0xff]  ;;  %v658_v7 = vld [vmem:[#allocation7 + $0x188] sm:$0xff] }
  0xb1   :  { %1170 = vmatprep.subr.bf16.mxu1 %v1169_v5  ;;  %v653_v5 = vld [vmem:[#allocation7 + $0x160] sm:$0xff]  ;;  %v775_v57 = vld [vmem:[#allocation8 + $0x88] sm:$0xff] }
  0xb2   :  { %1088 = vmatpush1.bf16.msra.mxu0 %v1087_v15  ;;  %v1109_v15 = vpack.c.bf16 %v278_v8, %v276_v4  ;;  %v1189_v4 = vpack.c.bf16 %v656_v60, %v654_v59  ;;  %v660_v8 = vld [vmem:[#allocation7 + $0x198] sm:$0xff] }
  0xb3   :  { %1090 = vmatprep.subr.bf16.mxu0 %v1089_v19  ;;  %v639_v19 = vld [vmem:[#allocation7 + $0xf0] sm:$0xff]  ;;  %v1193_v16 = vpack.c.bf16 %v660_v8, %v658_v7 }
  0xb4   :  { %1172 = vmatpush1.bf16.msra.mxu1 %v1171_v14  ;;  %v1175_v24 = vpack.c.bf16 %v639_v19, %v637_v18  ;;  %v1191_v14 = vpack.c.bf16 %v655_v6, %v653_v5  ;;  %v659_v18 = vld [vmem:[#allocation7 + $0x190] sm:$0xff]  ;;  %v662_v19 = vld [vmem:[#allocation7 + $0x1a8] sm:$0xff] }
  0xb5   :  { %1174 = vmatprep.subr.bf16.mxu1 %v1173_v17  ;;  %v657_v17 = vld [vmem:[#allocation7 + $0x180] sm:$0xff]  ;;  %v1197_v28 = vpack.c.bf16 %v664_v20, %v662_v19  ;;  %v761_v19 = vld [vmem:[#allocation8 + $0x18] sm:$0xff] }
  0xb6   :  { %1092 = vmatpush1.bf16.msra.mxu0 %v1091_v27  ;;  %v281_v27 = vld [vmem:[#allocation5 + $0x610] sm:$0xff]  ;;  %v778_v20 = vld [vmem:[#allocation8 + $0xa0] sm:$0xff] }
  0xb7   :  { %1094 = vmatprep.subr.bf16.mxu0 %v1093_v31  ;;  %v641_v31 = vld [vmem:[#allocation7 + $0x100] sm:$0xff]  ;;  %v1115_v36 = vpack.c.bf16 %v281_v27, %v279_v26  ;;  %v1195_v26 = vpack.c.bf16 %v659_v18, %v657_v17  ;;  %v306_v27 = vld [vmem:[#allocation5 + $0x6d8] sm:$0xff]  ;;  %v760_v18 = vld [vmem:[#allocation8 + $0x10] sm:$0xff] }
  0xb8   :  { %1176 = vmatpush1.bf16.msra.mxu1 %v1175_v24  ;;  %v1179_v41 = vpack.c.bf16 %v643_v32, %v641_v31  ;;  %v301_v24 = vld [vmem:[#allocation5 + $0x6b0] sm:$0xff] }
  0xb9   :  { %1178 = vmatprep.subr.bf16.mxu1 %v1177_v29  ;;  %v661_v29 = vld [vmem:[#allocation7 + $0x1a0] sm:$0xff] }
  0xba   :  { %1096 = vmatpush1.bf16.msra.mxu0 %v1095_v39  ;;  %v285_v39 = vld [vmem:[#allocation5 + $0x630] sm:$0xff] }
  0xbb   :  { %1098 = vmatprep.subr.bf16.mxu0 %v1097_v43  ;;  %v1181_v43 = vpack.c.bf16 %v648_v34, %v646_v33  ;;  %v1119_v48 = vpack.c.bf16 %v285_v39, %v283_v38  ;;  %v303_v33 = vld [vmem:[#allocation5 + $0x6c0] sm:$0xff]  ;;  %v305_v34 = vld [vmem:[#allocation5 + $0x6d0] sm:$0xff] }
  0xbc   :  { %1180 = vmatpush1.bf16.msra.mxu1 %v1179_v41  ;;  %v1139_v38 = vpack.c.bf16 %v305_v34, %v303_v33  ;;  %v309_v41 = vld [vmem:[#allocation5 + $0x6f0] sm:$0xff]  ;;  %v783_v33 = vld [vmem:[#allocation8 + $0xc8] sm:$0xff] }
  0xbd   :  { %1182 = vmatprep.subr.bf16.mxu1 %v1181_v43  ;;  %v1143_v42 = vpack.c.bf16 %v309_v41, %v307_v40  ;;  %v86_v43 = vld [vmem:[#allocation2 + $0x30] sm:$0xff] }
  0xbe   :  { %1100 = vmatpush1.bf16.msra.mxu0 %v1099_v51  ;;  %v287_v51 = vld [vmem:[#allocation5 + $0x640] sm:$0xff] }
  0xbf   :  { %1102 = vmatprep.subr.bf16.mxu0 %v1101_v55  ;;  %v294_v55 = vld [vmem:[#allocation5 + $0x678] sm:$0xff]  ;;  %v1123_v61 = vpack.c.bf16 %v289_v52, %v287_v51 }
  0xc0   :  { %v1125_v62 = vpack.c.bf16 %v294_v55, %v292_v53  ;;  %1184 = vmatpush1.bf16.msra.mxu1 %v1183_v54  ;;  %v672_v51 = vld [vmem:[#allocation7 + $0x1f8] sm:$0xff]  ;;  %v669_v53 = vld [vmem:[#allocation7 + $0x1e0] sm:$0xff]  ;;  %v671_v54 = vld [vmem:[#allocation7 + $0x1f0] sm:$0xff] }
  0xc1   :  { %1186 = vmatprep.subr.bf16.mxu1 %v1185_v56  ;;  %v1207_v55 = vpack.c.bf16 %v671_v54, %v669_v53  ;;  %v774_v56 = vld [vmem:[#allocation8 + $0x80] sm:$0xff]  ;;  %v772_v54 = vld [vmem:[#allocation8 + $0x70] sm:$0xff] }
  0xc2   :  { %1104 = vmatpush1.bf16.msra.mxu0 %v1103_v63  ;;  %v291_v63 = vld [vmem:[#allocation5 + $0x660] sm:$0xff]  ;;  %v1209_v58 = vpack.c.bf16 %v775_v57, %v774_v56  ;;  %v673_v57 = vld [vmem:[%s1518_s4] sm:$0x3]  ;;  %s1386_s4 = smov [#allocation10]  }
  0xc3   :  { %1106 = vmatprep.subr.bf16.mxu0 %v1105_v3  ;;  %v298_v3 = vld [vmem:[#allocation5 + $0x698] sm:$0xff]  ;;  %v1127_v9 = vpack.c.bf16 %v293_v0, %v291_v63  ;;  %v311_v0 = vld [vmem:[%s1516_s2] sm:$0x3]  ;;  %s874_s30 = sshll.u32 %s1386_s4, 4  ;;  %s875_s30 = int_to_ptr.vmem [resolvable:$true] %s874_s30 }
  0xc4   :  { %v1129_v10 = vpack.c.bf16 %v298_v3, %v296_v1  ;;  %1188 = vmatpush1.bf16.msra.mxu1 %v1187_v2  ;;  %s1347_s8 = scalar_lea.vmem %s875_s30, 128  ;;  %p1352_p5 = scmp.lt.s32.totalorder %s875_s30, %s875_s30 }
  0xc5   :  { %1190 = vmatprep.subr.bf16.mxu1 %v1189_v4  ;;  %p1348_p4 = scmp.ne.s32.totalorder %s875_s30, %s1347_s8  ;;  %p1353_p6 = scmp.lt.s32.totalorder %s1347_s8, %s1347_s8 }
  0xc6   :  { %1108 = vmatpush1.bf16.msra.mxu0 %v1107_v11  ;;  %v295_v11 = vld [vmem:[#allocation5 + $0x680] sm:$0xff] }
  0xc7   :  { %1110 = vmatprep.subr.bf16.mxu0 %v1109_v15  ;;  %v302_v15 = vld [vmem:[#allocation5 + $0x6b8] sm:$0xff]  ;;  %v1131_v21 = vpack.c.bf16 %v297_v12, %v295_v11  ;;  %v776_v12 = vld [vmem:[#allocation8 + $0x90] sm:$0xff]  ;;  %p1354_p7 = por %p1353_p6, %p1352_p5 }
  0xc8   :  { %v1133_v22 = vpack.c.bf16 %v302_v15, %v300_v13  ;;  %1192 = vmatpush1.bf16.msra.mxu1 %v1191_v14  ;;  %v777_v13 = vld [vmem:[#allocation8 + $0x98] sm:$0xff] }
  0xc9   :  { %1194 = vmatprep.subr.bf16.mxu1 %v1193_v16  ;;  %v1213_v17 = vpack.c.bf16 %v777_v13, %v776_v12  ;;  %p1355_p8 = pnand %p1354_p7, %p1348_p4 }
  0xca   :  { %1112 = vmatpush1.bf16.msra.mxu0 %v1111_v23  ;;  %v299_v23 = vld [vmem:[#allocation5 + $0x6a0] sm:$0xff] }
  0xcb   :  { %1114 = vmatprep.subr.bf16.mxu0 %v1113_v25  ;;  %v304_v25 = vld [vmem:[#allocation5 + $0x6c8] sm:$0xff]  ;;  %v1135_v31 = vpack.c.bf16 %v301_v24, %v299_v23  ;;  %v762_v24 = vld [vmem:[#allocation8 + $0x20] sm:$0xff] }
  0xcc   :  { %v1137_v32 = vpack.c.bf16 %v306_v27, %v304_v25  ;;  %1196 = vmatpush1.bf16.msra.mxu1 %v1195_v26  ;;  %v763_v25 = vld [vmem:[#allocation8 + $0x28] sm:$0xff]  ;;  %v780_v26 = vld [vmem:[#allocation8 + $0xb0] sm:$0xff]  ;;  %v781_v27 = vld [vmem:[#allocation8 + $0xb8] sm:$0xff] }
  0xcd   :  { %530 = vmatmul.mubr.f32.vlgmr.msra.gmra.mrb[0].mxu0 %v84_v35  ;;  %v1199_v35 = vpack.c.bf16 %v663_v30, %v661_v29  ;;  %1198 = vmatprep.subr.bf16.mxu1 %v1197_v28  ;;  %v1219_v28 = vpack.c.bf16 %v763_v25, %v762_v24  ;;  %v1221_v29 = vpack.c.bf16 %v781_v27, %v780_v26  ;;  %v764_v30 = vld [vmem:[#allocation8 + $0x30] sm:$0xff] }
  0xce   :  { %1116 = vmatpush1.bf16.msra.mxu0 %v1115_v36  ;;  %600 = vmatprep.mubr.f32.mxu0 %v1385_v49  ;;  %v308_v36 = vld [vmem:[#allocation5 + $0x6e8] sm:$0xff] }
  0xcf   :  { %1118 = vmatprep.subr.bf16.mxu0 %v1117_v37  ;;  %v310_v37 = vld [vmem:[#allocation5 + $0x6f8] sm:$0xff] }
  0xd0   :  { %v1141_v39 = vpack.c.bf16 %v310_v37, %v308_v36  ;;  %1200 = vmatpush1.bf16.msra.mxu1 %v1199_v35  ;;  %v766_v36 = vld [vmem:[#allocation8 + $0x40] sm:$0xff]  ;;  %v767_v37 = vld [vmem:[#allocation8 + $0x48] sm:$0xff] }
  0xd1   :  { %1202 = vmatprep.subr.bf16.mxu1 %v1201_v46  ;;  %v1227_v40 = vpack.c.bf16 %v767_v37, %v766_v36 }
  0xd2   :  { %1120 = vmatpush1.bf16.msra.mxu0 %v1119_v48  ;;  %v667_v48 = vld [vmem:[#allocation7 + $0x1d0] sm:$0xff] }
  0xd3   :  { %1122 = vmatprep.subr.bf16.mxu0 %v1121_v50  ;;  %v1203_v49 = vpack.c.bf16 %v667_v48, %v665_v47  ;;  %v670_v50 = vld [vmem:[#allocation7 + $0x1e8] sm:$0xff]  ;;  %v1233_v47 = vpack.c.bf16 %v787_v45, %v786_v44  ;;  %v770_v48 = vld [vmem:[#allocation8 + $0x60] sm:$0xff] }
  0xd4   :  { %v1205_v52 = vpack.c.bf16 %v672_v51, %v670_v50  ;;  %v788_v51 = vld [vmem:[#allocation8 + $0xf0] sm:$0xff] }
  0xd5   :  { %1204 = vmatpush1.bf16.msra.mxu1 %v1203_v49  ;;  %v771_v49 = vld [vmem:[#allocation8 + $0x68] sm:$0xff] }
  0xd6   :  { %1124 = vmatpush1.bf16.msra.mxu0 %v1123_v61  ;;  %1206 = vmatprep.subr.bf16.mxu1 %v1205_v52  ;;  %v313_v61 = vlaneseq  ;;  %v1235_v50 = vpack.c.bf16 %v771_v49, %v770_v48  ;;  %v789_v52 = vld [vmem:[#allocation8 + $0xf8] sm:$0xff] }
  0xd7   :  { %1126 = vmatprep.subr.bf16.mxu0 %v1125_v62  ;;  %v1237_v53 = vpack.c.bf16 %v789_v52, %v788_v51 }
  0xd8   :  { %v1481_v62 = vshrl.u32 %v313_v61, 7 }
  0xd9   :  { %1208 = vmatpush1.bf16.msra.mxu1 %v1207_v55  ;;  %v773_v55 = vld [vmem:[#allocation8 + $0x78] sm:$0xff] }
  0xda   :  { %1128 = vmatpush1.bf16.msra.mxu0 %v1127_v9  ;;  %1210 = vmatprep.subr.bf16.mxu1 %v1209_v58  ;;  %v315_v63 = vsub.s32 0, %v1481_v62  ;;  %v319_v1 = vsub.s32 1, %v1481_v62  ;;  %v758_v9 = vld [vmem:[#allocation8] sm:$0xff]  ;;  %v1239_v56 = vpack.c.bf16 %v773_v55, %v772_v54 }
  0xdb   :  { %1130 = vmatprep.subr.bf16.mxu0 %v1129_v10  ;;  %v759_v10 = vld [vmem:[#allocation8 + $0x8] sm:$0xff] }
  0xdc   :  { %v316_v2 = vrot.slane %v311_v0, %v315_v63  ;;  %v320_v3 = vrot.slane %v311_v0, %v319_v1  ;;  %v1211_v15 = vpack.c.bf16 %v759_v10, %v758_v9  ;;  %v678_v58 = vrot.slane %v673_v57, %v315_v63 }
  0xde   :  { %1132 = vmatpush1.bf16.msra.mxu0 %v1131_v21  ;;  %v779_v21 = vld [vmem:[#allocation8 + $0xa8] sm:$0xff] }
  0xdf   :  { %1134 = vmatprep.subr.bf16.mxu0 %v1133_v22  ;;  %v1215_v22 = vpack.c.bf16 %v761_v19, %v760_v18  ;;  %v1217_v23 = vpack.c.bf16 %v779_v21, %v778_v20 }
  0xe2   :  { %1136 = vmatpush1.bf16.msra.mxu0 %v1135_v31  ;;  %v765_v31 = vld [vmem:[#allocation8 + $0x38] sm:$0xff] }
  0xe3   :  { %1138 = vmatprep.subr.bf16.mxu0 %v1137_v32  ;;  %v782_v32 = vld [vmem:[#allocation8 + $0xc0] sm:$0xff]  ;;  %v1223_v34 = vpack.c.bf16 %v765_v31, %v764_v30 }
  0xe4   :  { %v1225_v35 = vpack.c.bf16 %v783_v33, %v782_v32 }
  0xe6   :  { %1140 = vmatpush1.bf16.msra.mxu0 %v1139_v38  ;;  %v784_v38 = vld [vmem:[#allocation8 + $0xd0] sm:$0xff] }
  0xe7   :  { %1142 = vmatprep.subr.bf16.mxu0 %v1141_v39  ;;  %v785_v39 = vld [vmem:[#allocation8 + $0xd8] sm:$0xff] }
  0xe8   :  { %v1229_v41 = vpack.c.bf16 %v785_v39, %v784_v38 }
  0xea   :  { %1144 = vmatpush1.bf16.msra.mxu0 %v1143_v42  ;;  %v768_v42 = vld [vmem:[#allocation8 + $0x50] sm:$0xff] }
  0xed   :  { %601 = vmatmul.mubr.f32.vlgmr.msra.gmra.mrb[0].mxu0 %v86_v43  ;;  %v769_v43 = vld [vmem:[#allocation8 + $0x58] sm:$0xff] }
  0xee   :  { %v1231_v46 = vpack.c.bf16 %v769_v43, %v768_v42 }
 0x16e   :  { %v389_v59 = vpop.f32.mrb[0].mxu1 }
 0x16f   :  { %v391_v60 = vpop.f32.mrb[1].mxu1  ;;  %v390_v4 = vadd.f32 %v389_v59, %v316_v2  ;;  %v682_v59 = vrot.slane %v673_v57, %v319_v1 }
 0x170   :  { %v392_v5 = vadd.f32 %v391_v60, %v320_v3 }
 0x1c0   :  { %v602_v6 = vpop.f32.mrb[0].mxu0 }
 0x1c1   :  { %v1242_v7 = vadd.f32 %v602_v6, %v390_v4  ;;  %v604_v8 = vpop.f32.mrb[1].mxu0  ;;  %v885_v6 = vld [vmem:[%s1520_s6] ss:$0 sm:$0xff] }
 0x1c2   :  { %v1244_v11 = vadd.f32 %v604_v8, %v392_v5 }
 0x1c3   :  { %v607_v16 = vmax.f32 %v1242_v7, 0.0 }
 0x1c4   :  { %v608_v14 = vmax.f32 %v1244_v11, 0.0 }
 0x1c6   :  { %749 = vmatprep.mubr.f32.mxu1 %v608_v14 }
 0x1c7   :  { %750 = vmatmul.mubr.f32.vlgmr.msra.gmra.mrb[2].mxu1 %v607_v16 }
 0x1c8   :  { %1212 = vmatpush3.bf16.msra.mxu1 %v1211_v15 }
 0x1c9   :  { %1214 = vmatprep.subr.bf16.mxu1 %v1213_v17 }
 0x1cc   :  { %1216 = vmatpush3.bf16.msra.mxu1 %v1215_v22 }
 0x1cd   :  { %1218 = vmatprep.subr.bf16.mxu1 %v1217_v23 }
 0x1d0   :  { %1220 = vmatpush3.bf16.msra.mxu1 %v1219_v28 }
 0x1d1   :  { %1222 = vmatprep.subr.bf16.mxu1 %v1221_v29 }
 0x1d4   :  { %1224 = vmatpush3.bf16.msra.mxu1 %v1223_v34 }
 0x1d5   :  { %1226 = vmatprep.subr.bf16.mxu1 %v1225_v35 }
 0x1d8   :  { %1228 = vmatpush3.bf16.msra.mxu1 %v1227_v40 }
 0x1d9   :  { %1230 = vmatprep.subr.bf16.mxu1 %v1229_v41 }
 0x1dc   :  { %1232 = vmatpush3.bf16.msra.mxu1 %v1231_v46 }
 0x1dd   :  { %1234 = vmatprep.subr.bf16.mxu1 %v1233_v47 }
 0x1e0   :  { %1236 = vmatpush3.bf16.msra.mxu1 %v1235_v50 }
 0x1e1   :  { %1238 = vmatprep.subr.bf16.mxu1 %v1237_v53 }
 0x1e4   :  { %1240 = vmatpush3.bf16.msra.mxu1 %v1239_v56 }
 0x29a   :  { %v751_v60 = vpop.f32.mrb[2].mxu1 }
 0x29b   :  { %v752_v61 = vadd.f32 %v751_v60, %v678_v58  ;;  %v753_v0 = vpop.f32.mrb[3].mxu1 }
 0x29c   :  { %v754_v2 = vadd.f32 %v753_v0, %v682_v59 }
 0x29d   :  { %v756_v4 = vmax.f32 %v752_v61, 0.0 }
 0x29e   :  { %v757_v3 = vmax.f32 %v754_v2, 0.0 }
 0x2a0   :  { %861 = vmatprep.mubr.f32.mxu1 %v757_v3 }
 0x2a1   :  { %862 = vmatmul.mubr.f32.vlgmr.msra.gmra.mrb[4].mxu1 %v756_v4 }
 0x374   :  { %v918_v5 = vpop.f32.mrb[4].mxu1 }
 0x375   :  { %v919_v7 = vpop.f32.mrb[5].mxu1 }
 0x376   :  { %v920_v63 = vadd.f32 %v919_v7, %v918_v5 }
 0x378   :  { %v864_v8 = vadd.f32 %v920_v63, %v885_v6 }
 0x37a   :  { %867 = vst [vmem:[#allocation10] sm:$0xff] %v864_v8 }
 0x37b   :  { %1358 = shalt.err (!%p1355_p8)
}
 0x37c   :  { %s1359_s13 = scalar_lea.hbm %s1521_s7, 128 }
 0x37d   :  { %p1360_p9 = scmp.ne.s32.totalorder %s1521_s7, %s1359_s13  ;;  %p1363_p10 = scmp.lt.u32.totalorder %s1359_s13, %s1521_s7 }
 0x37f   :  { %p1365_p11 = pnand %p1363_p10, %p1360_p9 }
 0x381   :  { %1368 = shalt.err (!%p1365_p11)
}
 0x382   :  { %877 = dma.vmem_to_hbm [thread:$0]  %s875_s30, 128, %s1521_s7, [#allocation4]  }
 0x383   :  { %1375 = dma.done.wait [#allocation4], 128  }
 0x384   :  { %1376 = vsyncadd [#allocation4], 4294967168 }
 0x385   :  { %881 = vsyncpa [#allocation3], 1 }
 0x386   :  { %882 = vsyncpa [#allocation6], 1 }
 0x387   :  { %883 = vsyncpa [#allocation9], 1 }
 0x388   :  { %884 = vsyncpa [#allocation4], 1 }

</bundles_post_ra>
